<compile_context>
chip_gen: v6e
topology: v6e:2x2x1
jax: 0.10.0
libtpu: 0.0.40
codegen_flags: <defaults>
</compile_context>

<pallas_src>
import functools

import jax
import jax.numpy as jnp
from jax.experimental import pallas as pl
from jax.experimental.pallas import tpu as pltpu

LANES = 128
SUBLANES = 8
TILE_ROWS_MAX = 2048  # multiple of 8; 2048x128 f32 tile = 1 MiB


def _dice_bce_kernel(x_ref, t_ref, inter_ref, spt_ref, sb_ref,
                     *, n_elem, steps, tile_rows, need_mask):
    s = pl.program_id(1)

    # Zero the resident (1, 1, 128) accumulators at the start of each
    # parallel chunk's reduction.
    @pl.when(s == 0)
    def _():
        inter_ref[...] = jnp.zeros_like(inter_ref)
        spt_ref[...] = jnp.zeros_like(spt_ref)
        sb_ref[...] = jnp.zeros_like(sb_ref)

    x = x_ref[...].astype(jnp.float32)
    t = t_ref[...].astype(jnp.float32)

    # Shared transcendentals: exp(-|x|) and log1p(exp(-|x|)).
    e = jnp.exp(-jnp.abs(x))
    lp = jnp.log1p(e)
    p = jnp.where(x >= 0.0, 1.0, e) / (1.0 + e)                 # sigmoid(x)
    # torch F.binary_cross_entropy clamps log terms at -100; equivalently clamp
    # the softplus terms at +100.
    nlog_p = jnp.minimum(jnp.maximum(-x, 0.0) + lp, 100.0)      # -log(p)
    nlog_1mp = jnp.minimum(jnp.maximum(x, 0.0) + lp, 100.0)     # -log(1-p)
    bce = t * nlog_p + (1.0 - t) * nlog_1mp

    if need_mask:
        # Zero out contributions from host-padded tail / Pallas grid overrun.
        blk = pl.program_id(0) * steps + s
        row0 = blk * tile_rows
        r = jax.lax.broadcasted_iota(jnp.int32, x.shape, 0)
        l = jax.lax.broadcasted_iota(jnp.int32, x.shape, 1)
        valid = (row0 + r) * LANES + l < n_elem
        zero = jnp.zeros_like(x)
        p = jnp.where(valid, p, zero)
        t = jnp.where(valid, t, zero)
        bce = jnp.where(valid, bce, zero)

    # Lane-wise partial sums (cross-sublane reduce only); the cross-lane
    # reduction happens once, outside the kernel.
    inter_ref[...] += jnp.sum(p * t, axis=0, keepdims=True)[None]
    spt_ref[...] += jnp.sum(p + t, axis=0, keepdims=True)[None]
    sb_ref[...] += jnp.sum(bce, axis=0, keepdims=True)[None]


@jax.jit
def dice_bce_loss(inputs, targets, smooth=1.0):
    """inputs: raw logits (any shape); targets: same shape, values in [0, 1]."""
    n_elem = inputs.size
    x = inputs.reshape(-1)
    t = targets.reshape(-1)

    # Pad only the ragged tail up to a (8,128) granule; masked out in-kernel.
    min_block = SUBLANES * LANES
    n_padded = pl.cdiv(n_elem, min_block) * min_block
    if n_padded != n_elem:
        x = jnp.pad(x, (0, n_padded - n_elem))
        t = jnp.pad(t, (0, n_padded - n_elem))

    rows = n_padded // LANES                 # multiple of 8
    tile_rows = min(TILE_ROWS_MAX, rows)     # multiple of 8
    nblocks = pl.cdiv(rows, tile_rows)
    n_par = 2 if nblocks >= 2 else 1         # shard across 2 TCs on v7x
    steps = pl.cdiv(nblocks, n_par)
    covered = n_par * steps * tile_rows * LANES
    need_mask = covered != n_elem

    x2 = x.reshape(rows, LANES)
    t2 = t.reshape(rows, LANES)

    if n_par * steps == nblocks:
        def in_map(pi, si):
            return (pi * steps + si, 0)
    else:
        def in_map(pi, si):
            # The last (pi, si) can fall past the final block; its contribution
            # is fully masked in-kernel, so clamp to any valid block.
            return (jnp.minimum(pi * steps + si, nblocks - 1), 0)

    kernel = functools.partial(
        _dice_bce_kernel,
        n_elem=int(n_elem), steps=int(steps),
        tile_rows=int(tile_rows), need_mask=bool(need_mask))

    partial_shape = jax.ShapeDtypeStruct((n_par, 1, LANES), jnp.float32)
    partial_spec = pl.BlockSpec((1, 1, LANES), lambda pi, si: (pi, 0, 0))

    inter_p, spt_p, sb_p = pl.pallas_call(
        kernel,
        out_shape=(partial_shape, partial_shape, partial_shape),
        grid_spec=pltpu.PrefetchScalarGridSpec(
            num_scalar_prefetch=0,
            grid=(n_par, steps),
            in_specs=[
                pl.BlockSpec((tile_rows, LANES), in_map),
                pl.BlockSpec((tile_rows, LANES), in_map),
            ],
            out_specs=[partial_spec, partial_spec, partial_spec],
        ),
        compiler_params=pltpu.CompilerParams(
            dimension_semantics=("parallel", "arbitrary")),
    )(x2, t2)

    # Final cross-core + cross-lane reduction and scalar loss math (tiny).
    intersection = jnp.sum(inter_p)
    sum_pt = jnp.sum(spt_p)
    sum_bce = jnp.sum(sb_p)
    dice_loss = 1.0 - (2.0 * intersection + smooth) / (sum_pt + smooth)
    bce_mean = sum_bce / n_elem
    return bce_mean + dice_loss


def _reference_dice_bce(inputs, targets, smooth=1.0):
    p = jax.nn.sigmoid(inputs.astype(jnp.float32)).reshape(-1)
    t = targets.astype(jnp.float32).reshape(-1)
    intersection = jnp.sum(p * t)
    dice = 1.0 - (2.0 * intersection + smooth) / (jnp.sum(p) + jnp.sum(t) + smooth)
    log_p = jnp.maximum(jnp.log(p), -100.0)
    log_1mp = jnp.maximum(jnp.log1p(-p), -100.0)
    bce = jnp.mean(-(t * log_p + (1.0 - t) * log_1mp))
    return bce + dice


if __name__ == "__main__":
    key = jax.random.PRNGKey(0)
    k_x, k_t = jax.random.split(key)

    # Small NCHW shapes, matching typical segmentation logits / binary masks.
    shape = (2, 4, 16, 16)
    logits = jax.random.normal(k_x, shape, dtype=jnp.float32)
    targets = jax.random.bernoulli(k_t, p=0.5, shape=shape).astype(jnp.float32)

    loss = dice_bce_loss(logits, targets, smooth=1.0)
    loss = jax.block_until_ready(loss)

    ref = _reference_dice_bce(logits, targets, smooth=1.0)
    assert jnp.allclose(loss, ref, rtol=1e-5, atol=1e-5), (loss, ref)

    print("KERNEL_OK")
</pallas_src>

<mosaic_0001>
module attributes {stable_mosaic.version = 11 : i64} {
  func.func @_dice_bce_kernel(%arg0: i32, %arg1: i32, %arg2: memref<16x128xf32, #tpu.memory_space<vmem>>, %arg3: memref<16x128xf32, #tpu.memory_space<vmem>>, %arg4: memref<1x1x128xf32, #tpu.memory_space<vmem>>, %arg5: memref<1x1x128xf32, #tpu.memory_space<vmem>>, %arg6: memref<1x1x128xf32, #tpu.memory_space<vmem>>) attributes {dimension_semantics = [#tpu.dimension_semantics<parallel>, #tpu.dimension_semantics<arbitrary>], iteration_bounds = array<i64: 1, 1>, scalar_prefetch = 0 : i64, scratch_operands = 0 : i64, tpu.core_type = #tpu.core_type<tc>, window_params = [{transform_indices = @transform_0, window_bounds = array<i64: 16, 128>}, {transform_indices = @transform_1, window_bounds = array<i64: 16, 128>}, {transform_indices = @transform_2, window_bounds = array<i64: 1, 1, 128>}, {transform_indices = @transform_3, window_bounds = array<i64: 1, 1, 128>}, {transform_indices = @transform_4, window_bounds = array<i64: 1, 1, 128>}]} {
    %c0_i32 = arith.constant 0 : i32
    %0 = arith.cmpi eq, %arg1, %c0_i32 : i32
    %1 = arith.extui %0 : i1 to i32
    %c0_i32_0 = arith.constant 0 : i32
    %2 = arith.cmpi ne, %1, %c0_i32_0 : i32
    scf.if %2 {
      %cst_34 = arith.constant 0.000000e+00 : f32
      %54 = vector.broadcast %cst_34 : f32 to vector<1x1x128xf32>
      %c0_35 = arith.constant 0 : index
      %c0_36 = arith.constant 0 : index
      %c0_37 = arith.constant 0 : index
      %55 = vector.load %arg4[%c0_35, %c0_36, %c0_37] : memref<1x1x128xf32, #tpu.memory_space<vmem>>, vector<1x1x128xf32>
      tpu.vector_store %arg4[%c0_35, %c0_36, %c0_37], %54 {strides = array<i32>} : memref<1x1x128xf32, #tpu.memory_space<vmem>>, vector<1x1x128xf32>,
      %cst_38 = arith.constant 0.000000e+00 : f32
      %56 = vector.broadcast %cst_38 : f32 to vector<1x1x128xf32>
      %c0_39 = arith.constant 0 : index
      %c0_40 = arith.constant 0 : index
      %c0_41 = arith.constant 0 : index
      %57 = vector.load %arg5[%c0_39, %c0_40, %c0_41] : memref<1x1x128xf32, #tpu.memory_space<vmem>>, vector<1x1x128xf32>
      tpu.vector_store %arg5[%c0_39, %c0_40, %c0_41], %56 {strides = array<i32>} : memref<1x1x128xf32, #tpu.memory_space<vmem>>, vector<1x1x128xf32>,
      %cst_42 = arith.constant 0.000000e+00 : f32
      %58 = vector.broadcast %cst_42 : f32 to vector<1x1x128xf32>
      %c0_43 = arith.constant 0 : index
      %c0_44 = arith.constant 0 : index
      %c0_45 = arith.constant 0 : index
      %59 = vector.load %arg6[%c0_43, %c0_44, %c0_45] : memref<1x1x128xf32, #tpu.memory_space<vmem>>, vector<1x1x128xf32>
      tpu.vector_store %arg6[%c0_43, %c0_44, %c0_45], %58 {strides = array<i32>} : memref<1x1x128xf32, #tpu.memory_space<vmem>>, vector<1x1x128xf32>,
    } else {
    }
    %c0 = arith.constant 0 : index
    %c0_1 = arith.constant 0 : index
    %3 = vector.load %arg2[%c0, %c0_1] : memref<16x128xf32, #tpu.memory_space<vmem>>, vector<16x128xf32>
    %c0_2 = arith.constant 0 : index
    %c0_3 = arith.constant 0 : index
    %4 = vector.load %arg3[%c0_2, %c0_3] : memref<16x128xf32, #tpu.memory_space<vmem>>, vector<16x128xf32>
    %5 = math.absf %3 : vector<16x128xf32>
    %cst = arith.constant 0.000000e+00 : f32
    %6 = vector.broadcast %cst : f32 to vector<16x128xf32>
    %7 = arith.subf %6, %5 : vector<16x128xf32>
    %8 = math.exp %7 : vector<16x128xf32>
    %9 = math.log1p %8 : vector<16x128xf32>
    %cst_4 = arith.constant 0.000000e+00 : f32
    %10 = vector.broadcast %cst_4 : f32 to vector<16x128xf32>
    %11 = arith.cmpf oge, %3, %10 : vector<16x128xf32>
    %cst_5 = arith.constant 1.000000e+00 : f32
    %12 = vector.broadcast %cst_5 : f32 to vector<16x128xf32>
    %13 = arith.select %11, %12, %8 : vector<16x128xi1>, vector<16x128xf32>
    %cst_6 = arith.constant 1.000000e+00 : f32
    %14 = vector.broadcast %cst_6 : f32 to vector<16x128xf32>
    %15 = arith.addf %14, %8 : vector<16x128xf32>
    %16 = arith.divf %13, %15 : vector<16x128xf32>
    %cst_7 = arith.constant 0.000000e+00 : f32
    %17 = vector.broadcast %cst_7 : f32 to vector<16x128xf32>
    %18 = arith.subf %17, %3 : vector<16x128xf32>
    %cst_8 = arith.constant 0.000000e+00 : f32
    %19 = vector.broadcast %cst_8 : f32 to vector<16x128xf32>
    %20 = arith.maximumf %18, %19 : vector<16x128xf32>
    %21 = arith.addf %20, %9 : vector<16x128xf32>
    %cst_9 = arith.constant 1.000000e+02 : f32
    %22 = vector.broadcast %cst_9 : f32 to vector<16x128xf32>
    %23 = arith.minimumf %21, %22 : vector<16x128xf32>
    %cst_10 = arith.constant 0.000000e+00 : f32
    %24 = vector.broadcast %cst_10 : f32 to vector<16x128xf32>
    %25 = arith.maximumf %3, %24 : vector<16x128xf32>
    %26 = arith.addf %25, %9 : vector<16x128xf32>
    %cst_11 = arith.constant 1.000000e+02 : f32
    %27 = vector.broadcast %cst_11 : f32 to vector<16x128xf32>
    %28 = arith.minimumf %26, %27 : vector<16x128xf32>
    %29 = arith.mulf %4, %23 : vector<16x128xf32>
    %cst_12 = arith.constant 1.000000e+00 : f32
    %30 = vector.broadcast %cst_12 : f32 to vector<16x128xf32>
    %31 = arith.subf %30, %4 : vector<16x128xf32>
    %32 = arith.mulf %31, %28 : vector<16x128xf32>
    %33 = arith.addf %29, %32 : vector<16x128xf32>
    %c0_13 = arith.constant 0 : index
    %c0_14 = arith.constant 0 : index
    %c0_15 = arith.constant 0 : index
    %34 = vector.load %arg4[%c0_13, %c0_14, %c0_15] : memref<1x1x128xf32, #tpu.memory_space<vmem>>, vector<1x1x128xf32>
    %35 = arith.mulf %16, %4 : vector<16x128xf32>
    %cst_16 = arith.constant dense<0.000000e+00> : vector<128xf32>
    %36 = vector.multi_reduction <add>, %35, %cst_16 [0] : vector<16x128xf32> to vector<128xf32>
    %37 = vector.shape_cast %36 : vector<128xf32> to vector<1x128xf32>
    %38 = vector.shape_cast %37 : vector<1x128xf32> to vector<1x1x128xf32>
    %39 = arith.addf %34, %38 : vector<1x1x128xf32>
    %c0_17 = arith.constant 0 : index
    %c0_18 = arith.constant 0 : index
    %c0_19 = arith.constant 0 : index
    %40 = vector.load %arg4[%c0_17, %c0_18, %c0_19] : memref<1x1x128xf32, #tpu.memory_space<vmem>>, vector<1x1x128xf32>
    tpu.vector_store %arg4[%c0_17, %c0_18, %c0_19], %39 {strides = array<i32>} : memref<1x1x128xf32, #tpu.memory_space<vmem>>, vector<1x1x128xf32>,
    %c0_20 = arith.constant 0 : index
    %c0_21 = arith.constant 0 : index
    %c0_22 = arith.constant 0 : index
    %41 = vector.load %arg5[%c0_20, %c0_21, %c0_22] : memref<1x1x128xf32, #tpu.memory_space<vmem>>, vector<1x1x128xf32>
    %42 = arith.addf %16, %4 : vector<16x128xf32>
    %cst_23 = arith.constant dense<0.000000e+00> : vector<128xf32>
    %43 = vector.multi_reduction <add>, %42, %cst_23 [0] : vector<16x128xf32> to vector<128xf32>
    %44 = vector.shape_cast %43 : vector<128xf32> to vector<1x128xf32>
    %45 = vector.shape_cast %44 : vector<1x128xf32> to vector<1x1x128xf32>
    %46 = arith.addf %41, %45 : vector<1x1x128xf32>
    %c0_24 = arith.constant 0 : index
    %c0_25 = arith.constant 0 : index
    %c0_26 = arith.constant 0 : index
    %47 = vector.load %arg5[%c0_24, %c0_25, %c0_26] : memref<1x1x128xf32, #tpu.memory_space<vmem>>, vector<1x1x128xf32>
    tpu.vector_store %arg5[%c0_24, %c0_25, %c0_26], %46 {strides = array<i32>} : memref<1x1x128xf32, #tpu.memory_space<vmem>>, vector<1x1x128xf32>,
    %c0_27 = arith.constant 0 : index
    %c0_28 = arith.constant 0 : index
    %c0_29 = arith.constant 0 : index
    %48 = vector.load %arg6[%c0_27, %c0_28, %c0_29] : memref<1x1x128xf32, #tpu.memory_space<vmem>>, vector<1x1x128xf32>
    %cst_30 = arith.constant dense<0.000000e+00> : vector<128xf32>
    %49 = vector.multi_reduction <add>, %33, %cst_30 [0] : vector<16x128xf32> to vector<128xf32>
    %50 = vector.shape_cast %49 : vector<128xf32> to vector<1x128xf32>
    %51 = vector.shape_cast %50 : vector<1x128xf32> to vector<1x1x128xf32>
    %52 = arith.addf %48, %51 : vector<1x1x128xf32>
    %c0_31 = arith.constant 0 : index
    %c0_32 = arith.constant 0 : index
    %c0_33 = arith.constant 0 : index
    %53 = vector.load %arg6[%c0_31, %c0_32, %c0_33] : memref<1x1x128xf32, #tpu.memory_space<vmem>>, vector<1x1x128xf32>
    tpu.vector_store %arg6[%c0_31, %c0_32, %c0_33], %52 {strides = array<i32>} : memref<1x1x128xf32, #tpu.memory_space<vmem>>, vector<1x1x128xf32>,
    return
  }
  func.func @transform_0(%arg0: i32, %arg1: i32) -> (i32, i32) {
    %c1_i32 = arith.constant 1 : i32
    %0 = arith.muli %arg0, %c1_i32 : i32
    %1 = arith.addi %0, %arg1 : i32
    %c0_i32 = arith.constant 0 : i32
    %c0_i32_0 = arith.constant 0 : i32
    return %1, %c0_i32 : i32, i32
  }
  func.func @transform_1(%arg0: i32, %arg1: i32) -> (i32, i32) {
    %c1_i32 = arith.constant 1 : i32
    %0 = arith.muli %arg0, %c1_i32 : i32
    %1 = arith.addi %0, %arg1 : i32
    %c0_i32 = arith.constant 0 : i32
    %c0_i32_0 = arith.constant 0 : i32
    return %1, %c0_i32 : i32, i32
  }
  func.func @transform_2(%arg0: i32, %arg1: i32) -> (i32, i32, i32) {
    %c0_i32 = arith.constant 0 : i32
    %c0_i32_0 = arith.constant 0 : i32
    %c0_i32_1 = arith.constant 0 : i32
    return %arg0, %c0_i32, %c0_i32_0 : i32, i32, i32
  }
  func.func @transform_3(%arg0: i32, %arg1: i32) -> (i32, i32, i32) {
    %c0_i32 = arith.constant 0 : i32
    %c0_i32_0 = arith.constant 0 : i32
    %c0_i32_1 = arith.constant 0 : i32
    return %arg0, %c0_i32, %c0_i32_0 : i32, i32, i32
  }
  func.func @transform_4(%arg0: i32, %arg1: i32) -> (i32, i32, i32) {
    %c0_i32 = arith.constant 0 : i32
    %c0_i32_0 = arith.constant 0 : i32
    %c0_i32_1 = arith.constant 0 : i32
    return %arg0, %c0_i32, %c0_i32_0 : i32, i32, i32
  }
}

</mosaic_0001>

<bundles_post_ra>
// kernel: dice_bce_loss.1
= control target key start
LH: loop header
LB: loop body
LE: loop exit
PB: predicated region body
PF: predicated region fallthrough
CT: control target
= control target key end

     0   :  { %v198_v0 = vmov 0.0   ;;  %s263_s2 = inlined_call_operand.vmem [shape: f32[1,1,128], index: 2, kind: output, shape index: {0}]   ;;  %s264_s3 = inlined_call_operand.vmem [shape: f32[1,1,128], index: 3, kind: output, shape index: {1}]   ;;  %s265_s4 = inlined_call_operand.vmem [shape: f32[1,1,128], index: 4, kind: output, shape index: {2}]   ;;  %s266_s0 = inlined_call_operand.vmem [shape: f32[16,128], index: 0, kind: input, shape index: {}]   ;;  %s267_s1 = inlined_call_operand.vmem [shape: f32[16,128], index: 1, kind: input, shape index: {}]  }
   0x1   :  { %62 = vst [vmem:[%s263_s2] sm:$0x1] %v198_v0  ;;  %63 = vst [vmem:[%s264_s3] sm:$0x1] %v198_v0  ;;  %v65_v1 = vld [vmem:[%s266_s0] sm:$0xff]  ;;  %v66_v2 = vld [vmem:[%s266_s0 + $0x8] sm:$0xff] }
   0x2   :  { %64 = vst [vmem:[%s265_s4] sm:$0x1] %v198_v0  ;;  %v69_v3 = vand.u32 2147483647, %v65_v1  ;;  %v70_v4 = vand.u32 2147483647, %v66_v2  ;;  %vm95_vm0 = vcmp.ge.f32.partialorder %v65_v1, 0.0 }
   0x3   :  { %vm96_vm1 = vcmp.ge.f32.partialorder %v66_v2, 0.0  ;;  %v105_v16 = vsub.f32 0.0, %v65_v1  ;;  %v106_v20 = vsub.f32 0.0, %v66_v2  ;;  %v113_v24 = vmax.f32 %v65_v1, 0.0  ;;  %v67_v31 = vld [vmem:[%s267_s1] sm:$0xff]  ;;  %v68_v36 = vld [vmem:[%s267_s1 + $0x8] sm:$0xff] }
   0x4   :  { %v71_v5 = vsub.f32 0.0, %v69_v3  ;;  %v72_v6 = vsub.f32 0.0, %v70_v4  ;;  %v114_v29 = vmax.f32 %v66_v2, 0.0  ;;  %v121_v44 = vsub.f32 1.0, %v67_v31 }
   0x5   :  { %v107_v28 = vmax.f32 %v105_v16, 0.0  ;;  %v108_v34 = vmax.f32 %v106_v20, 0.0  ;;  %v122_v52 = vsub.f32 1.0, %v68_v36 }
   0x6   :  { %v73_v7 = vmul.f32 1.442695, %v71_v5  ;;  %v75_v8 = vmul.f32 1.442695, %v72_v6 }
   0x8   :  { %186 = vpow2.f32 %v73_v7 }
   0x9   :  { %188 = vpow2.f32 %v75_v8 }
  0x15   :  { %v187_v9 = vpop.eup %186 }
  0x16   :  { %v189_v10 = vpop.eup %188  ;;  %v77_v11 = vadd.f32 1.0, %v187_v9  ;;  %v80_v13 = vmul.f32 -0.5, %v187_v9  ;;  %v97_v17 = vsel %vm95_vm0, 1.0, %v187_v9  ;;  %v83_v18 = vand.u32 2147483647, %v187_v9 }
  0x17   :  { %v86_v12 = vadd.f32 1.0, %v189_v10  ;;  %v89_v14 = vmul.f32 -0.5, %v189_v10  ;;  %v98_v21 = vsel %vm96_vm1, 1.0, %v189_v10  ;;  %v92_v22 = vand.u32 2147483647, %v189_v10 }
  0x18   :  { %190 = vrcp.f32 %v77_v11  ;;  %v81_v15 = vadd.f32 1.0, %v80_v13  ;;  %vm84_vm2 = vcmp.lt.f32.partialorder %v83_v18, 0.0004427343 }
  0x19   :  { %192 = vrcp.f32 %v86_v12  ;;  %v90_v19 = vadd.f32 1.0, %v89_v14  ;;  %vm93_vm3 = vcmp.lt.f32.partialorder %v92_v22, 0.0004427343 }
  0x1a   :  { %194 = vlog2.f32 %v77_v11  ;;  %v82_v27 = vmul.f32 %v187_v9, %v81_v15  ;;  %v139_v11 = vld [vmem:[%s264_s3] sm:$0x1] }
  0x1b   :  { %196 = vlog2.f32 %v86_v12  ;;  %v91_v33 = vmul.f32 %v189_v10, %v90_v19  ;;  %v127_v10 = vld [vmem:[%s263_s2] sm:$0x1] }
  0x25   :  { %v191_v23 = vpop.eup %190 }
  0x26   :  { %v193_v25 = vpop.eup %192  ;;  %v102_v26 = vmul.f32 %v191_v23, %v97_v17 }
  0x27   :  { %v195_v30 = vpop.eup %194  ;;  %v104_v32 = vmul.f32 %v193_v25, %v98_v21  ;;  %v151_v21 = vld [vmem:[%s265_s4] sm:$0x1] }
  0x28   :  { %v197_v35 = vpop.eup %196  ;;  %v128_v37 = vmul.f32 %v102_v26, %v67_v31  ;;  %v140_v38 = vadd.f32 %v102_v26, %v67_v31  ;;  %v79_v39 = vmul.f32 0.6931472, %v195_v30 }
  0x29   :  { %v129_v40 = vmul.f32 %v104_v32, %v68_v36  ;;  %v141_v41 = vadd.f32 %v104_v32, %v68_v36  ;;  %v88_v42 = vmul.f32 0.6931472, %v197_v35 }
  0x2a   :  { %v85_v43 = vsel %vm84_vm2, %v82_v27, %v79_v39 }
  0x2b   :  { %v130_v45 = vadd.f32 %v129_v40, %v128_v37  ;;  %v142_v46 = vadd.f32 %v141_v41, %v140_v38  ;;  %v94_v47 = vsel %vm93_vm3, %v91_v33, %v88_v42  ;;  %v109_v48 = vadd.f32 %v107_v28, %v85_v43 }
  0x2c   :  { %v110_v49 = vadd.f32 %v108_v34, %v94_v47  ;;  %v115_v50 = vadd.f32 %v113_v24, %v85_v43  ;;  %v116_v51 = vadd.f32 %v114_v29, %v94_v47 }
  0x2d   :  { %v131_v53 = vrot.slane %v130_v45, 4  ;;  %v143_v54 = vrot.slane %v142_v46, 4  ;;  %v111_v55 = vmin.f32 %v109_v48, 100.0 }
  0x2e   :  { %v112_v56 = vmin.f32 %v110_v49, 100.0  ;;  %v117_v57 = vmin.f32 %v115_v50, 100.0  ;;  %v118_v58 = vmin.f32 %v116_v51, 100.0 }
  0x2f   :  { %v132_v59 = vadd.f32 %v131_v53, %v130_v45  ;;  %v144_v60 = vadd.f32 %v143_v54, %v142_v46  ;;  %v119_v61 = vmul.f32 %v111_v55, %v67_v31 }
  0x30   :  { %v120_v62 = vmul.f32 %v112_v56, %v68_v36  ;;  %v123_v63 = vmul.f32 %v121_v44, %v117_v57  ;;  %v124_v0 = vmul.f32 %v122_v52, %v118_v58 }
  0x31   :  { %v133_v1 = vrot.slane %v132_v59, 2  ;;  %v145_v2 = vrot.slane %v144_v60, 2 }
  0x32   :  { %v125_v3 = vadd.f32 %v123_v63, %v119_v61  ;;  %v126_v4 = vadd.f32 %v124_v0, %v120_v62 }
  0x33   :  { %v134_v5 = vadd.f32 %v133_v1, %v132_v59  ;;  %v146_v6 = vadd.f32 %v145_v2, %v144_v60 }
  0x34   :  { %v152_v7 = vadd.f32 %v126_v4, %v125_v3 }
  0x35   :  { %v135_v8 = vrot.slane %v134_v5, 1  ;;  %v147_v9 = vrot.slane %v146_v6, 1 }
  0x36   :  { %v153_v12 = vrot.slane %v152_v7, 4 }
  0x37   :  { %v136_v13 = vadd.f32 %v135_v8, %v134_v5  ;;  %v148_v14 = vadd.f32 %v147_v9, %v146_v6 }
  0x38   :  { %v154_v15 = vadd.f32 %v153_v12, %v152_v7 }
  0x39   :  { %v137_v16 = vadd.f32 %v136_v13, %v127_v10  ;;  %v149_v17 = vadd.f32 %v148_v14, %v139_v11 }
  0x3a   :  { %v155_v18 = vrot.slane %v154_v15, 2 }
  0x3b   :  { %138 = vst [vmem:[%s263_s2] sm:$0x1] %v137_v16  ;;  %150 = vst [vmem:[%s264_s3] sm:$0x1] %v149_v17 }
  0x3c   :  { %v156_v19 = vadd.f32 %v155_v18, %v154_v15 }
  0x3e   :  { %v157_v20 = vrot.slane %v156_v19, 1 }
  0x40   :  { %v158_v22 = vadd.f32 %v157_v20, %v156_v19 }
  0x42   :  { %v159_v23 = vadd.f32 %v158_v22, %v151_v21 }
  0x44   :  { %160 = vst [vmem:[%s265_s4] sm:$0x1] %v159_v23 }

</bundles_post_ra>
